<compile_context>
chip_gen: v7x
topology: tpu7x:2x2x1
jax: 0.10.0
libtpu: 0.0.40
codegen_flags: <defaults>
</compile_context>

<pallas_src>
import functools

import jax
import jax.numpy as jnp
from jax.experimental import pallas as pl
from jax.experimental.pallas import tpu as pltpu


def _decode_kernel(awh_ref, p_ref, o_ref, *, stride_w, stride_h, grid_w, lane_tile):
    """One (batch, lane-tile) block.

    awh_ref : VMEM (A, 2, 1)       anchor_w*stride_w / anchor_h*stride_h (pixels)
    p_ref   : VMEM (A, attrs, TL)  raw prediction rows for every anchor
    o_ref   : VMEM (A, attrs, TL)  decoded rows
    """
    t = pl.program_id(1)

    # Flattened spatial index of every lane in this tile, as f32 (exact: < 2^23).
    idx = (jax.lax.broadcasted_iota(jnp.int32, (1, 1, lane_tile), 2)
           + t * lane_tile).astype(jnp.float32)
    # row = idx // W, col = idx % W without integer div/mod: the +0.5 keeps the
    # quotient strictly inside (k, k+1) so floor() is robust to f32 rounding.
    gy = jnp.floor((idx + 0.5) / grid_w)          # (1, 1, TL)
    gx = idx - gy * grid_w                        # (1, 1, TL)

    # bx = (sigmoid(tx) + grid_x) * stride_w ; by likewise with stride_h.
    o_ref[:, 0:1, :] = (jax.nn.sigmoid(p_ref[:, 0:1, :]) + gx) * stride_w
    o_ref[:, 1:2, :] = (jax.nn.sigmoid(p_ref[:, 1:2, :]) + gy) * stride_h
    # bw = exp(tw) * scaled_anchor_w * stride_w  (the product is precomputed).
    o_ref[:, 2:3, :] = jnp.exp(p_ref[:, 2:3, :]) * awh_ref[:, 0:1, :]
    o_ref[:, 3:4, :] = jnp.exp(p_ref[:, 3:4, :]) * awh_ref[:, 1:2, :]
    # objectness + class probabilities: plain sigmoid (the exp rows above are
    # excluded, so the EUP only does the transcendental work it needs).
    o_ref[:, 4:, :] = jax.nn.sigmoid(p_ref[:, 4:, :])


def _pick_lane_tile(hw, max_tile=2048):
    """Largest multiple-of-128 divisor of hw that is <= max_tile.

    Falls back to the full extent when hw is not a multiple of 128 (legal,
    since a block dim equal to the array dim is always allowed; real YOLOv3
    heads give hw = 169 / 676 / 2704).
    """
    if hw % 128 != 0:
        return hw
    tile = (min(hw, max_tile) // 128) * 128
    while hw % tile != 0:
        tile -= 128
    return tile


def decode_box_native(x, anchors, num_classes, img_size, *, max_lane_tile=2048):
    """Decoded predictions in the kernel-native (B, A, attrs, H*W) layout.

    Prefer this layout downstream: converting to the PyTorch (B, A*H*W, attrs)
    layout costs one extra full HBM read+write of the output (see decode_box).
    """
    B, C, H, W = x.shape
    A = anchors.shape[0]
    attrs = 5 + num_classes
    assert C == A * attrs, (C, A, attrs)
    HW = H * W

    stride_h = float(img_size[1]) / H
    stride_w = float(img_size[0]) / W
    # scaled_anchor * stride == anchor in image pixels; precompute the product
    # so the kernel does one multiply per w/h element (and no per-step scalars).
    strides = jnp.array([stride_w, stride_h], jnp.float32)
    anchor_wh = ((anchors.astype(jnp.float32) / strides) * strides).reshape(A, 2, 1)

    pred = x.astype(jnp.float32).reshape(B, A, attrs, HW)   # free reshape (NCHW)

    lane_tile = _pick_lane_tile(HW, max_lane_tile)
    n_tiles = HW // lane_tile

    kernel = functools.partial(
        _decode_kernel, stride_w=stride_w, stride_h=stride_h,
        grid_w=float(W), lane_tile=lane_tile)

    n_elems = B * A * attrs * HW
    cost = pl.CostEstimate(
        flops=6 * n_elems,
        transcendentals=2 * n_elems,          # ~1 exp (+1 recip) per element
        bytes_accessed=2 * n_elems * 4,       # read pred + write output (f32)
    )

    return pl.pallas_call(
        kernel,
        out_shape=jax.ShapeDtypeStruct((B, A, attrs, HW), jnp.float32),
        grid=(B, n_tiles),
        in_specs=[
            # tiny per-anchor (w, h) pixel scale, same block every step
            pl.BlockSpec((A, 2, 1), lambda b, t: (0, 0, 0)),
            # all anchors + all attrs for one batch / one lane tile per step
            pl.BlockSpec((None, A, attrs, lane_tile), lambda b, t: (b, 0, 0, t)),
        ],
        out_specs=pl.BlockSpec((None, A, attrs, lane_tile), lambda b, t: (b, 0, 0, t)),
        compiler_params=pltpu.CompilerParams(
            dimension_semantics=("parallel", "parallel")),
        cost_estimate=cost,
    )(anchor_wh, pred)


def decode_box(x, anchors, num_classes, img_size):
    """Pallas implementation of DecodeBox.forward (PyTorch output layout).

    x        : (B, A*(5+num_classes), H, W) float32
    anchors  : (A, 2) float32 anchor (w, h) in image pixels
    img_size : (img_w, img_h)
    returns  : (B, A*H*W, 5+num_classes) float32

    NOTE: the transpose below is one extra HBM pass over the output; consumers
    that can work with the (B, A, attrs, H*W) layout should use
    decode_box_native directly.
    """
    B, _, H, W = x.shape
    A = anchors.shape[0]
    attrs = 5 + num_classes
    out = decode_box_native(x, anchors, num_classes, img_size)
    return out.transpose(0, 1, 3, 2).reshape(B, A * H * W, attrs)


def decode_box_ref(x, anchors, num_classes, img_size):
    """Pure-JAX reference mirroring the PyTorch forward exactly."""
    B, C, H, W = x.shape
    A = anchors.shape[0]
    attrs = 5 + num_classes
    stride_h = float(img_size[1]) / H
    stride_w = float(img_size[0]) / W
    sa = anchors.astype(jnp.float32) / jnp.array([stride_w, stride_h], jnp.float32)

    p = x.astype(jnp.float32).reshape(B, A, attrs, H, W).transpose(0, 1, 3, 4, 2)
    sig = jax.nn.sigmoid(p)
    gx = jnp.arange(W, dtype=jnp.float32)[None, None, None, :]
    gy = jnp.arange(H, dtype=jnp.float32)[None, None, :, None]
    bx = (sig[..., 0] + gx) * stride_w
    by = (sig[..., 1] + gy) * stride_h
    bw = jnp.exp(p[..., 2]) * sa[:, 0][None, :, None, None] * stride_w
    bh = jnp.exp(p[..., 3]) * sa[:, 1][None, :, None, None] * stride_h
    conf = sig[..., 4]
    cls = sig[..., 5:]
    boxes = jnp.stack([bx, by, bw, bh], axis=-1)
    out = jnp.concatenate([boxes, conf[..., None], cls], axis=-1)
    return out.reshape(B, -1, attrs)


if __name__ == "__main__":
    # Small, deterministic configuration consistent with the module.
    B = 2
    num_classes = 4
    num_anchors = 3
    attrs = 5 + num_classes                 # 9
    H = W = 16                              # HW = 256 (one lane tile)
    img_size = (128, 128)                   # stride = 8

    # Deterministic anchors (one YOLO scale: 3 anchors, (w, h) in pixels).
    anchors = jnp.array([[10.0, 13.0],
                         [16.0, 30.0],
                         [33.0, 23.0]], dtype=jnp.float32)

    key = jax.random.PRNGKey(0)
    x = jax.random.normal(key, (B, num_anchors * attrs, H, W), dtype=jnp.float32)

    out = decode_box(x, anchors, num_classes, img_size)
    out = jax.block_until_ready(out)

    ref = decode_box_ref(x, anchors, num_classes, img_size)
    assert out.shape == (B, num_anchors * H * W, attrs), out.shape
    assert jnp.allclose(out, ref, rtol=1e-5, atol=1e-5), "mismatch vs reference"

    print("KERNEL_OK")
</pallas_src>

<mosaic_0001>
module attributes {stable_mosaic.version = 11 : i64} {
  func.func @_decode_kernel(%arg0: i32, %arg1: i32, %arg2: memref<3x2x1xf32, #tpu.memory_space<vmem>>, %arg3: memref<1x3x9x256xf32, #tpu.memory_space<vmem>>, %arg4: memref<1x3x9x256xf32, #tpu.memory_space<vmem>>) attributes {dimension_semantics = [#tpu.dimension_semantics<parallel>, #tpu.dimension_semantics<parallel>], iteration_bounds = array<i64: 2, 1>, scalar_prefetch = 0 : i64, scratch_operands = 0 : i64, tpu.core_type = #tpu.core_type<tc>, window_params = [{pipeline_mode = #tpu.pipeline_mode<synchronous>, transform_indices = @transform_0, window_bounds = array<i64: 3, 2, 1>}, {transform_indices = @transform_1, window_bounds = array<i64: 1, 3, 9, 256>}, {transform_indices = @transform_2, window_bounds = array<i64: 1, 3, 9, 256>}]} {
    %0 = tpu.iota {dimensions = array<i32: 2>} : vector<1x1x256xi32>
    %c256_i32 = arith.constant 256 : i32
    %1 = arith.muli %arg1, %c256_i32 : i32
    %2 = vector.broadcast %1 : i32 to vector<1x1x256xi32>
    %3 = arith.addi %0, %2 : vector<1x1x256xi32>
    %4 = arith.sitofp %3 : vector<1x1x256xi32> to vector<1x1x256xf32>
    %cst = arith.constant 5.000000e-01 : f32
    %5 = vector.broadcast %cst : f32 to vector<1x1x256xf32>
    %6 = arith.addf %4, %5 : vector<1x1x256xf32>
    %cst_0 = arith.constant 1.600000e+01 : f32
    %7 = vector.broadcast %cst_0 : f32 to vector<1x1x256xf32>
    %8 = arith.divf %6, %7 : vector<1x1x256xf32>
    %9 = math.floor %8 : vector<1x1x256xf32>
    %cst_1 = arith.constant 1.600000e+01 : f32
    %10 = vector.broadcast %cst_1 : f32 to vector<1x1x256xf32>
    %11 = arith.mulf %9, %10 : vector<1x1x256xf32>
    %12 = arith.subf %4, %11 : vector<1x1x256xf32>
    %c0 = arith.constant 0 : index
    %c0_2 = arith.constant 0 : index
    %c0_3 = arith.constant 0 : index
    %c0_4 = arith.constant 0 : index
    %13 = vector.load %arg3[%c0, %c0_2, %c0_3, %c0_4] : memref<1x3x9x256xf32, #tpu.memory_space<vmem>>, vector<1x3x1x256xf32>
    %14 = vector.shape_cast %13 : vector<1x3x1x256xf32> to vector<3x1x256xf32>
    %15 = arith.negf %14 : vector<3x1x256xf32>
    %16 = math.exp %15 : vector<3x1x256xf32>
    %cst_5 = arith.constant 1.000000e+00 : f32
    %17 = vector.broadcast %cst_5 : f32 to vector<3x1x256xf32>
    %18 = arith.addf %17, %16 : vector<3x1x256xf32>
    %19 = arith.divf %17, %18 : vector<3x1x256xf32>
    %20 = vector.broadcast %12 : vector<1x1x256xf32> to vector<3x1x256xf32>
    %21 = arith.addf %19, %20 : vector<3x1x256xf32>
    %cst_6 = arith.constant 8.000000e+00 : f32
    %22 = vector.broadcast %cst_6 : f32 to vector<3x1x256xf32>
    %23 = arith.mulf %21, %22 : vector<3x1x256xf32>
    %c0_7 = arith.constant 0 : index
    %c0_8 = arith.constant 0 : index
    %c0_9 = arith.constant 0 : index
    %c0_10 = arith.constant 0 : index
    %24 = vector.load %arg4[%c0_7, %c0_8, %c0_9, %c0_10] : memref<1x3x9x256xf32, #tpu.memory_space<vmem>>, vector<1x3x1x256xf32>
    %25 = vector.shape_cast %24 : vector<1x3x1x256xf32> to vector<3x1x256xf32>
    %26 = vector.shape_cast %23 : vector<3x1x256xf32> to vector<1x3x1x256xf32>
    tpu.vector_store %arg4[%c0_7, %c0_8, %c0_9, %c0_10], %26 {strides = array<i32>} : memref<1x3x9x256xf32, #tpu.memory_space<vmem>>, vector<1x3x1x256xf32>,
    %c0_11 = arith.constant 0 : index
    %c0_12 = arith.constant 0 : index
    %c1 = arith.constant 1 : index
    %c0_13 = arith.constant 0 : index
    %27 = vector.load %arg3[%c0_11, %c0_12, %c1, %c0_13] : memref<1x3x9x256xf32, #tpu.memory_space<vmem>>, vector<1x3x1x256xf32>
    %28 = vector.shape_cast %27 : vector<1x3x1x256xf32> to vector<3x1x256xf32>
    %29 = arith.negf %28 : vector<3x1x256xf32>
    %30 = math.exp %29 : vector<3x1x256xf32>
    %cst_14 = arith.constant 1.000000e+00 : f32
    %31 = vector.broadcast %cst_14 : f32 to vector<3x1x256xf32>
    %32 = arith.addf %31, %30 : vector<3x1x256xf32>
    %33 = arith.divf %31, %32 : vector<3x1x256xf32>
    %34 = vector.broadcast %9 : vector<1x1x256xf32> to vector<3x1x256xf32>
    %35 = arith.addf %33, %34 : vector<3x1x256xf32>
    %cst_15 = arith.constant 8.000000e+00 : f32
    %36 = vector.broadcast %cst_15 : f32 to vector<3x1x256xf32>
    %37 = arith.mulf %35, %36 : vector<3x1x256xf32>
    %c0_16 = arith.constant 0 : index
    %c0_17 = arith.constant 0 : index
    %c1_18 = arith.constant 1 : index
    %c0_19 = arith.constant 0 : index
    %38 = vector.load %arg4[%c0_16, %c0_17, %c1_18, %c0_19] : memref<1x3x9x256xf32, #tpu.memory_space<vmem>>, vector<1x3x1x256xf32>
    %39 = vector.shape_cast %38 : vector<1x3x1x256xf32> to vector<3x1x256xf32>
    %40 = vector.shape_cast %37 : vector<3x1x256xf32> to vector<1x3x1x256xf32>
    tpu.vector_store %arg4[%c0_16, %c0_17, %c1_18, %c0_19], %40 {strides = array<i32>} : memref<1x3x9x256xf32, #tpu.memory_space<vmem>>, vector<1x3x1x256xf32>,
    %c0_20 = arith.constant 0 : index
    %c0_21 = arith.constant 0 : index
    %c2 = arith.constant 2 : index
    %c0_22 = arith.constant 0 : index
    %41 = vector.load %arg3[%c0_20, %c0_21, %c2, %c0_22] : memref<1x3x9x256xf32, #tpu.memory_space<vmem>>, vector<1x3x1x256xf32>
    %42 = vector.shape_cast %41 : vector<1x3x1x256xf32> to vector<3x1x256xf32>
    %43 = math.exp %42 : vector<3x1x256xf32>
    %c0_23 = arith.constant 0 : index
    %c0_24 = arith.constant 0 : index
    %c0_25 = arith.constant 0 : index
    %44 = vector.load %arg2[%c0_23, %c0_24, %c0_25] : memref<3x2x1xf32, #tpu.memory_space<vmem>>, vector<3x1x1xf32>
    %45 = vector.broadcast %44 : vector<3x1x1xf32> to vector<3x1x256xf32>
    %46 = arith.mulf %43, %45 : vector<3x1x256xf32>
    %c0_26 = arith.constant 0 : index
    %c0_27 = arith.constant 0 : index
    %c2_28 = arith.constant 2 : index
    %c0_29 = arith.constant 0 : index
    %47 = vector.load %arg4[%c0_26, %c0_27, %c2_28, %c0_29] : memref<1x3x9x256xf32, #tpu.memory_space<vmem>>, vector<1x3x1x256xf32>
    %48 = vector.shape_cast %47 : vector<1x3x1x256xf32> to vector<3x1x256xf32>
    %49 = vector.shape_cast %46 : vector<3x1x256xf32> to vector<1x3x1x256xf32>
    tpu.vector_store %arg4[%c0_26, %c0_27, %c2_28, %c0_29], %49 {strides = array<i32>} : memref<1x3x9x256xf32, #tpu.memory_space<vmem>>, vector<1x3x1x256xf32>,
    %c0_30 = arith.constant 0 : index
    %c0_31 = arith.constant 0 : index
    %c3 = arith.constant 3 : index
    %c0_32 = arith.constant 0 : index
    %50 = vector.load %arg3[%c0_30, %c0_31, %c3, %c0_32] : memref<1x3x9x256xf32, #tpu.memory_space<vmem>>, vector<1x3x1x256xf32>
    %51 = vector.shape_cast %50 : vector<1x3x1x256xf32> to vector<3x1x256xf32>
    %52 = math.exp %51 : vector<3x1x256xf32>
    %c0_33 = arith.constant 0 : index
    %c1_34 = arith.constant 1 : index
    %c0_35 = arith.constant 0 : index
    %53 = vector.load %arg2[%c0_33, %c1_34, %c0_35] : memref<3x2x1xf32, #tpu.memory_space<vmem>>, vector<3x1x1xf32>
    %54 = vector.broadcast %53 : vector<3x1x1xf32> to vector<3x1x256xf32>
    %55 = arith.mulf %52, %54 : vector<3x1x256xf32>
    %c0_36 = arith.constant 0 : index
    %c0_37 = arith.constant 0 : index
    %c3_38 = arith.constant 3 : index
    %c0_39 = arith.constant 0 : index
    %56 = vector.load %arg4[%c0_36, %c0_37, %c3_38, %c0_39] : memref<1x3x9x256xf32, #tpu.memory_space<vmem>>, vector<1x3x1x256xf32>
    %57 = vector.shape_cast %56 : vector<1x3x1x256xf32> to vector<3x1x256xf32>
    %58 = vector.shape_cast %55 : vector<3x1x256xf32> to vector<1x3x1x256xf32>
    tpu.vector_store %arg4[%c0_36, %c0_37, %c3_38, %c0_39], %58 {strides = array<i32>} : memref<1x3x9x256xf32, #tpu.memory_space<vmem>>, vector<1x3x1x256xf32>,
    %c0_40 = arith.constant 0 : index
    %c0_41 = arith.constant 0 : index
    %c4 = arith.constant 4 : index
    %c0_42 = arith.constant 0 : index
    %59 = vector.load %arg3[%c0_40, %c0_41, %c4, %c0_42] : memref<1x3x9x256xf32, #tpu.memory_space<vmem>>, vector<1x3x5x256xf32>
    %60 = vector.shape_cast %59 : vector<1x3x5x256xf32> to vector<3x5x256xf32>
    %61 = arith.negf %60 : vector<3x5x256xf32>
    %62 = math.exp %61 : vector<3x5x256xf32>
    %cst_43 = arith.constant 1.000000e+00 : f32
    %63 = vector.broadcast %cst_43 : f32 to vector<3x5x256xf32>
    %64 = arith.addf %63, %62 : vector<3x5x256xf32>
    %65 = arith.divf %63, %64 : vector<3x5x256xf32>
    %c0_44 = arith.constant 0 : index
    %c0_45 = arith.constant 0 : index
    %c4_46 = arith.constant 4 : index
    %c0_47 = arith.constant 0 : index
    %66 = vector.load %arg4[%c0_44, %c0_45, %c4_46, %c0_47] : memref<1x3x9x256xf32, #tpu.memory_space<vmem>>, vector<1x3x5x256xf32>
    %67 = vector.shape_cast %66 : vector<1x3x5x256xf32> to vector<3x5x256xf32>
    %68 = vector.shape_cast %65 : vector<3x5x256xf32> to vector<1x3x5x256xf32>
    tpu.vector_store %arg4[%c0_44, %c0_45, %c4_46, %c0_47], %68 {strides = array<i32>} : memref<1x3x9x256xf32, #tpu.memory_space<vmem>>, vector<1x3x5x256xf32>,
    return
  }
  func.func @transform_0(%arg0: i32, %arg1: i32) -> (i32, i32, i32) {
    %c0_i32 = arith.constant 0 : i32
    %c0_i32_0 = arith.constant 0 : i32
    %c0_i32_1 = arith.constant 0 : i32
    %c0_i32_2 = arith.constant 0 : i32
    return %c0_i32, %c0_i32_0, %c0_i32_1 : i32, i32, i32
  }
  func.func @transform_1(%arg0: i32, %arg1: i32) -> (i32, i32, i32, i32) {
    %c0_i32 = arith.constant 0 : i32
    %c0_i32_0 = arith.constant 0 : i32
    %c0_i32_1 = arith.constant 0 : i32
    return %arg0, %c0_i32, %c0_i32_0, %arg1 : i32, i32, i32, i32
  }
  func.func @transform_2(%arg0: i32, %arg1: i32) -> (i32, i32, i32, i32) {
    %c0_i32 = arith.constant 0 : i32
    %c0_i32_0 = arith.constant 0 : i32
    %c0_i32_1 = arith.constant 0 : i32
    return %arg0, %c0_i32, %c0_i32_0, %arg1 : i32, i32, i32, i32
  }
}

</mosaic_0001>

<bundles_post_ra>
// kernel: tpu_custom_call.1
= control target key start
LH: loop header
LB: loop body
LE: loop exit
PB: predicated region body
PF: predicated region fallthrough
CT: control target
= control target key end

     0   :  { %s813_s9 = smov 0   ;;  %s815_s10 = smov 0   ;;  %s958_s0 = inlined_call_operand.vmem [shape: f32[3,2,1], index: 0, kind: input, shape index: {}]   ;;  %s959_s1 = inlined_call_operand.vmem [shape: f32[2,3,9,256], index: 1, kind: input, shape index: {}]   ;;  %s960_s2 = inlined_call_operand.vmem [shape: f32[2,3,9,256], index: 2, kind: output, shape index: {}]  }
   0x1   :  { %s817_s11 = smov 0  }
   0x2 LB: > { %s24_s12 = sadd.s32 1, %s790_s10  ;;  %p614_p0 = scmp.ge.s32.totalorder %s794_s11, 1  ;;  %s794_s11 = sphi %s817_s11, %s12_s11   ;;  %s790_s10 = sphi %s815_s10, %s964_s10   ;;  %s786_s9 = sphi %s813_s9, %s963_s9  }
   0x3   : > { %p26_p1 = scmp.ge.s32.totalorder %s24_s12, 2  ;;  %p133_p2 = scmp.lt.s32.totalorder %s794_s11, 3 }
   0x5   : > { %s966_s12 = smov (%p26_p1, %s24_s12), 0  ;;  %p134_p3 = pnand %p614_p0, %p133_p2 }
   0x6   : > { %v333_v0 = vld [vmem:[%s958_s0 + $0x4] sm:$0x1] (!%p134_p3)  ;;  %v331_v1 = vld [vmem:[%s958_s0] sm:$0x1] (!%p134_p3)  ;;  %p164_p4 = scmp.lt.s32.totalorder (!%p134_p3), %s786_s9, 1  ;;  %v183_v2 = vlaneseq (!%p134_p3)  ;;  %v796_v3 = vmov (!%p134_p3), 0  }
   0x7   : > { %137 = sbr.rel (%p134_p3) target bundleno = 149 (0x95), region = 28  ;;  %687 = vset.pattern.permute.xlu1 (!%p134_p3), %v796_v3  ;;  %686 = vset.pattern.permute.xlu0 (!%p134_p3), %v796_v3  ;;  %v385_v5 = vld [vmem:[%s958_s0 + $0x1] sm:$0x1] (!%p134_p3)  ;;  %v332_v6 = vld [vmem:[%s958_s0 + $0x2] sm:$0x1] (!%p134_p3) }
   0x8   : > { %344 = vperm.xlu1 (!%p134_p3), %687, %v333_v0   ;;  %336 = vperm.xlu0 (!%p134_p3), %686, %v331_v1   ;;  %v184_v4 = vand.u32 (!%p134_p3), 127, %v183_v2  ;;  %v387_v9 = vld [vmem:[%s958_s0 + $0x5] sm:$0x1] (!%p134_p3)  ;;  %v386_v10 = vld [vmem:[%s958_s0 + $0x3] sm:$0x1] (!%p134_p3)  ;;  %v871_v46 = vshrl.u32 (!%p134_p3), %v183_v2, 7 }
   0x9   : > { %v797_v30 = vmov (!%p134_p3), 1966171168   ;;  %vm890_vm0 = vcmp.lt.s32.totalorder (!%p134_p3), %v183_v2, 256 }
   0xa   : > { %v185_v7 = vadd.s32 (!%p134_p3), 128, %v184_v4  ;;  %v190_v8 = vcvt.s32.f32 (!%p134_p3), %v184_v4  ;;  %v230_v31 = vunpack.c.l.s4 (!%p134_p3), %v797_v30 }
   0xc   : > { %390 = vperm.xlu1 (!%p134_p3), %687, %v385_v5   ;;  %340 = vperm.xlu0 (!%p134_p3), %686, %v332_v6   ;;  %v191_v11 = vcvt.s32.f32 (!%p134_p3), %v185_v7  ;;  %v192_v12 = vadd.f32 (!%p134_p3), 0.5, %v190_v8  ;;  %v231_v38 = vunpack.c.0.s8 (!%p134_p3), %v230_v31 }
   0xe   : > { %s968_s9 = smov (!%p164_p4, %s786_s9), 1  ;;  %v193_v15 = vadd.f32 0.5, %v191_v11  ;;  %v195_v16 = vmul.f32 0.0625, %v192_v12  ;;  %v234_v52 = vsub.s32 %v231_v38, %v871_v46 }
   0xf   : > { %s659_s21 = smul.u32 96, %s968_s9 }
  0x10   : > { %398 = vperm.xlu1 %687, %v387_v9   ;;  %394 = vperm.xlu0 %686, %v386_v10   ;;  %v196_v21 = vmul.f32 0.0625, %v193_v15  ;;  %v197_v23 = vfloor.f32 %v195_v16 }
  0x11   : > { %s858_s28 = scalar_lea.vmem %s959_s1, %s659_s21  ;;  %s887_s3 = scalar_lea.vmem %s960_s2, %s659_s21 }
  0x12   : > { %v203_v13 = vld [vmem:[%s858_s28] ss:$8 sm:$0x3]  ;;  %v624_v22 = vld [vmem:[%s858_s28 + $0x1] ss:$8 sm:$0x3]  ;;  %v198_v26 = vfloor.f32 %v196_v21 }
  0x13   : > { %v617_v14 = vld [vmem:[%s858_s28 + $0x20] ss:$8 sm:$0x3]  ;;  %v619_v18 = vmul.f32 -1.442695, %v203_v13  ;;  %v199_v32 = vmul.f32 16.0, %v197_v23 }
  0x14   : > { %v618_v17 = vld [vmem:[%s858_s28 + $0x40] ss:$8 sm:$0x3]  ;;  %v620_v19 = vmul.f32 -1.442695, %v617_v14  ;;  %v200_v33 = vmul.f32 16.0, %v198_v26  ;;  %v288_v62 = vcombine.low %v197_v23, %v198_v26 }
  0x15   : > { %v621_v20 = vmul.f32 -1.442695, %v618_v17  ;;  %688 = vpow2.f32 %v619_v18  ;;  %v625_v24 = vld [vmem:[%s858_s28 + $0x21] ss:$8 sm:$0x3]  ;;  %v201_v41 = vsub.f32 %v190_v8, %v199_v32 }
  0x16   : > { %v626_v25 = vld [vmem:[%s858_s28 + $0x41] ss:$8 sm:$0x3]  ;;  %690 = vpow2.f32 %v620_v19  ;;  %v627_v27 = vmul.f32 -1.442695, %v624_v22  ;;  %v202_v42 = vsub.f32 %v191_v11, %v200_v33  ;;  %v295_v11 = vrot.slane %v288_v62, %v234_v52 }
  0x17   : > { %692 = vpow2.f32 %v621_v20  ;;  %v628_v28 = vmul.f32 -1.442695, %v625_v24  ;;  %v629_v29 = vmul.f32 -1.442695, %v626_v25  ;;  %v427_v34 = vld [vmem:[%s858_s28] sm:$0xf0] }
  0x18   : > { %694 = vpow2.f32 %v627_v27  ;;  %v428_v35 = vld [vmem:[%s858_s28 + $0x8] sm:$0xf0]  ;;  %v429_v36 = vld [vmem:[%s858_s28 + $0x10] sm:$0x1]  ;;  %v430_v37 = vld [vmem:[%s858_s28 + $0x18] sm:$0x1]  ;;  %v228_v51 = vcombine.low %v201_v41, %v202_v42  ;;  %v302_v22 = vrot.slane %v295_v11, %v234_v52 }
  0x19   : > { %696 = vpow2.f32 %v628_v28  ;;  %v645_v39 = vmul.f32 -1.442695, %v427_v34  ;;  %v646_v40 = vmul.f32 -1.442695, %v428_v35  ;;  %v647_v43 = vmul.f32 -1.442695, %v429_v36 }
  0x1a   : > { %698 = vpow2.f32 %v629_v29  ;;  %v648_v44 = vmul.f32 -1.442695, %v430_v37  ;;  %v431_v53 = vld [vmem:[%s858_s28 + $0x20] sm:$0xf0]  ;;  %v432_v56 = vld [vmem:[%s858_s28 + $0x28] sm:$0xf0]  ;;  %v235_v1 = vrot.slane %v228_v51, %v234_v52 }
  0x1b   : > { %700 = vpow2.f32 %v645_v39  ;;  %v433_v59 = vld [vmem:[%s858_s28 + $0x30] sm:$0x1]  ;;  %v434_v63 = vld [vmem:[%s858_s28 + $0x38] sm:$0x1]  ;;  %v649_v0 = vmul.f32 -1.442695, %v431_v53 }
  0x1c   : > { %702 = vpow2.f32 %v646_v40  ;;  %v435_v4 = vld [vmem:[%s858_s28 + $0x40] sm:$0xf0]  ;;  %v650_v5 = vmul.f32 -1.442695, %v432_v56  ;;  %v436_v6 = vld [vmem:[%s858_s28 + $0x48] sm:$0xf0]  ;;  %v242_v15 = vrot.slane %v235_v1, %v234_v52 }
  0x1d   : > { %704 = vpow2.f32 %v647_v43  ;;  %v651_v7 = vmul.f32 -1.442695, %v433_v59  ;;  %v437_v8 = vld [vmem:[%s858_s28 + $0x50] sm:$0x1]  ;;  %v652_v9 = vmul.f32 -1.442695, %v434_v63 }
  0x1e   : > { %706 = vpow2.f32 %v648_v44  ;;  %v438_v12 = vld [vmem:[%s858_s28 + $0x58] sm:$0x1]  ;;  %v653_v13 = vmul.f32 -1.442695, %v435_v4  ;;  %v654_v16 = vmul.f32 -1.442695, %v436_v6 }
  0x1f   : > { %v689_v45 = vpop.eup %688  ;;  %v655_v18 = vmul.f32 -1.442695, %v437_v8  ;;  %v656_v20 = vmul.f32 -1.442695, %v438_v12 }
  0x20   : > { %v691_v47 = vpop.eup %690  ;;  %v217_v48 = vadd.f32 1.0, %v689_v45  ;;  %v633_v11 = vld [vmem:[%s858_s28 + $0x2] ss:$8 sm:$0x3] }
  0x21   : > { %v693_v49 = vpop.eup %692  ;;  %v218_v50 = vadd.f32 1.0, %v691_v47 }
  0x22   : > { %v695_v54 = vpop.eup %694  ;;  %v219_v55 = vadd.f32 1.0, %v693_v49  ;;  %708 = vrcp.f32 %v217_v48 }
  0x23   : > { %v697_v57 = vpop.eup %696  ;;  %710 = vrcp.f32 %v218_v50  ;;  %v277_v58 = vadd.f32 1.0, %v695_v54 }
  0x24   : > { %v699_v60 = vpop.eup %698  ;;  %712 = vrcp.f32 %v219_v55  ;;  %v278_v61 = vadd.f32 1.0, %v697_v57 }
  0x25   : > { %v279_v3 = vadd.f32 1.0, %v699_v60  ;;  %714 = vrcp.f32 %v277_v58  ;;  %v701_v10 = vpop.eup %700 }
  0x26   : > { %716 = vrcp.f32 %v278_v61  ;;  %v703_v14 = vpop.eup %702  ;;  %v475_v23 = vadd.f32 1.0, %v701_v10  ;;  %v635_v10 = vld [vmem:[%s858_s28 + $0x42] ss:$8 sm:$0x3] }
  0x27   : > { %718 = vrcp.f32 %v279_v3  ;;  %v705_v17 = vpop.eup %704  ;;  %v476_v26 = vadd.f32 1.0, %v703_v14  ;;  %v329_v12 = vmul.f32 1.442695, %v635_v10  ;;  %v639_v14 = vld [vmem:[%s858_s28 + $0x3] ss:$8 sm:$0x3] }
  0x28   : > { %720 = vpow2.f32 %v649_v0  ;;  %v707_v19 = vpop.eup %706  ;;  %v477_v29 = vadd.f32 1.0, %v705_v17 }
  0x29   : > { %722 = vpow2.f32 %v650_v5  ;;  %v478_v33 = vadd.f32 1.0, %v707_v19  ;;  %v640_v19 = vld [vmem:[%s858_s28 + $0x23] ss:$8 sm:$0x3] }
  0x2a   : > { %724 = vpow2.f32 %v651_v7 }
  0x2b   : > { %726 = vpow2.f32 %v652_v9 }
  0x2c   : > { %v709_v21 = vpop.eup %708  ;;  %728 = vpow2.f32 %v653_v13  ;;  %v325_v13 = vmul.f32 1.442695, %v633_v11 }
  0x2d   : > { %v711_v24 = vpop.eup %710  ;;  %v244_v25 = vadd.f32 %v709_v21, %v242_v15  ;;  %730 = vpow2.f32 %v654_v16  ;;  %v379_v16 = vmul.f32 1.442695, %v639_v14  ;;  %v381_v21 = vmul.f32 1.442695, %v640_v19 }
  0x2e   : > { %v713_v27 = vpop.eup %712  ;;  %v245_v28 = vadd.f32 %v711_v24, %v242_v15  ;;  %732 = vpow2.f32 %v655_v18  ;;  %v641_v18 = vld [vmem:[%s858_s28 + $0x43] ss:$8 sm:$0x3] }
  0x2f   : > { %v715_v30 = vpop.eup %714  ;;  %v246_v31 = vadd.f32 %v713_v27, %v242_v15  ;;  %v247_v32 = vmul.f32 8.0, %v244_v25  ;;  %734 = vpow2.f32 %v656_v20  ;;  %v634_v15 = vld [vmem:[%s858_s28 + $0x22] ss:$8 sm:$0x3]  ;;  %v383_v20 = vmul.f32 1.442695, %v641_v18 }
  0x30   : > { %v717_v34 = vpop.eup %716  ;;  %v248_v35 = vmul.f32 8.0, %v245_v28  ;;  %v304_v37 = vadd.f32 %v715_v30, %v302_v22  ;;  %736 = vrcp.f32 %v475_v23  ;;  %v327_v17 = vmul.f32 1.442695, %v634_v15 }
  0x31   : > { %v719_v38 = vpop.eup %718  ;;  %v249_v39 = vmul.f32 8.0, %v246_v31  ;;  %254 = vst.msk [vmem:[%s887_s3] ss:$8 sm:$0x3] %vm890_vm0, %v247_v32  ;;  %v305_v40 = vadd.f32 %v717_v34, %v302_v22  ;;  %738 = vrcp.f32 %v476_v26 }
  0x32   : > { %v721_v41 = vpop.eup %720  ;;  %622 = vst.msk [vmem:[%s887_s3 + $0x20] ss:$8 sm:$0x3] %vm890_vm0, %v248_v35  ;;  %v306_v42 = vadd.f32 %v719_v38, %v302_v22  ;;  %v307_v2 = vmul.f32 8.0, %v304_v37  ;;  %740 = vrcp.f32 %v477_v29  ;;  %v348_v22 = vsub.s32 0, %v871_v46 }
  0x33   : > { %v723_v43 = vpop.eup %722  ;;  %623 = vst.msk [vmem:[%s887_s3 + $0x40] ss:$8 sm:$0x3] %vm890_vm0, %v249_v39  ;;  %v308_v44 = vmul.f32 8.0, %v305_v40  ;;  %v479_v45 = vadd.f32 1.0, %v721_v41  ;;  %742 = vrcp.f32 %v478_v33 }
  0x34   : > { %v725_v47 = vpop.eup %724  ;;  %v309_v48 = vmul.f32 8.0, %v306_v42  ;;  %630 = vst.msk [vmem:[%s887_s3 + $0x1] ss:$8 sm:$0x3] %vm890_vm0, %v307_v2  ;;  %v480_v49 = vadd.f32 1.0, %v723_v43 }
  0x35   : > { %v727_v50 = vpop.eup %726  ;;  %631 = vst.msk [vmem:[%s887_s3 + $0x21] ss:$8 sm:$0x3] %vm890_vm0, %v308_v44  ;;  %v481_v51 = vadd.f32 1.0, %v725_v47  ;;  %744 = vrcp.f32 %v479_v45 }
  0x36   : > { %v729_v52 = vpop.eup %728  ;;  %632 = vst.msk [vmem:[%s887_s3 + $0x41] ss:$8 sm:$0x3] %vm890_vm0, %v309_v48  ;;  %v482_v53 = vadd.f32 1.0, %v727_v50  ;;  %746 = vrcp.f32 %v480_v49 }
  0x37   : > { %v731_v54 = vpop.eup %730  ;;  %v483_v55 = vadd.f32 1.0, %v729_v52  ;;  %748 = vrcp.f32 %v481_v51 }
  0x38   : > { %v733_v56 = vpop.eup %732  ;;  %v484_v57 = vadd.f32 1.0, %v731_v54  ;;  %750 = vrcp.f32 %v482_v53 }
  0x39   : > { %v735_v58 = vpop.eup %734  ;;  %v485_v59 = vadd.f32 1.0, %v733_v56  ;;  %752 = vrcp.f32 %v483_v55 }
  0x3a   : > { %v737_v60 = vpop.eup %736  ;;  %v486_v61 = vadd.f32 1.0, %v735_v58  ;;  %754 = vrcp.f32 %v484_v57 }
  0x3b   : > { %v739_v62 = vpop.eup %738  ;;  %756 = vrcp.f32 %v485_v59  ;;  %511 = vst [vmem:[%s887_s3] sm:$0xf0] %v737_v60 }
  0x3c   : > { %v741_v63 = vpop.eup %740  ;;  %758 = vrcp.f32 %v486_v61  ;;  %512 = vst [vmem:[%s887_s3 + $0x8] sm:$0xf0] %v739_v62 }
  0x3d   : > { %v743_v0 = vpop.eup %742  ;;  %513 = vst [vmem:[%s887_s3 + $0x10] sm:$0x1] %v741_v63  ;;  %760 = vpow2.f32 %v329_v12 }
  0x3e   : > { %514 = vst [vmem:[%s887_s3 + $0x18] sm:$0x1] %v743_v0  ;;  %762 = vpow2.f32 %v325_v13 }
  0x3f   : > { %v745_v1 = vpop.eup %744  ;;  %764 = vpow2.f32 %v379_v16 }
  0x40   : > { %v747_v3 = vpop.eup %746  ;;  %515 = vst [vmem:[%s887_s3 + $0x20] sm:$0xf0] %v745_v1  ;;  %766 = vpow2.f32 %v327_v17 }
  0x41   : > { %v749_v4 = vpop.eup %748  ;;  %516 = vst [vmem:[%s887_s3 + $0x28] sm:$0xf0] %v747_v3  ;;  %768 = vpow2.f32 %v383_v20 }
  0x42   : > { %v751_v5 = vpop.eup %750  ;;  %517 = vst [vmem:[%s887_s3 + $0x30] sm:$0x1] %v749_v4  ;;  %770 = vpow2.f32 %v381_v21 }
  0x43   : > { %v753_v6 = vpop.eup %752  ;;  %518 = vst [vmem:[%s887_s3 + $0x38] sm:$0x1] %v751_v5 }
  0x44   : > { %v755_v7 = vpop.eup %754  ;;  %519 = vst [vmem:[%s887_s3 + $0x40] sm:$0xf0] %v753_v6 }
  0x45   : > { %v757_v8 = vpop.eup %756  ;;  %520 = vst [vmem:[%s887_s3 + $0x48] sm:$0xf0] %v755_v7 }
  0x46   : > { %v759_v9 = vpop.eup %758  ;;  %521 = vst [vmem:[%s887_s3 + $0x50] sm:$0x1] %v757_v8 }
  0x47   : > { %522 = vst [vmem:[%s887_s3 + $0x58] sm:$0x1] %v759_v9  ;;  %v761_v23 = vpop.eup %760 }
  0x48   : > { %v763_v24 = vpop.eup %762 }
  0x49   : > { %v765_v29 = vpop.eup %764 }
  0x4a   : > { %v767_v32 = vpop.eup %766 }
  0x4b   : > { %v769_v37 = vpop.eup %768 }
  0x4c   : > { %v771_v40 = vpop.eup %770 }
  0x87   : > { %v345_v25 = vpop.permute.xlu1 %344  ;;  %v337_v26 = vpop.permute.xlu0 %336 }
  0x88   : > { %v357_v27 = vrot.slane %v345_v25, %v348_v22  ;;  %v349_v28 = vrot.slane %v337_v26, %v348_v22 }
  0x8a   : > { %v363_v30 = vmul.f32 %v761_v23, %v357_v27  ;;  %v361_v31 = vmul.f32 %v763_v24, %v349_v28 }
  0x8b   : > { %v391_v33 = vpop.permute.xlu1 %390  ;;  %v341_v34 = vpop.permute.xlu0 %340 }
  0x8c   : > { %638 = vst.msk [vmem:[%s887_s3 + $0x42] ss:$8 sm:$0x3] %vm890_vm0, %v363_v30  ;;  %636 = vst.msk [vmem:[%s887_s3 + $0x2] ss:$8 sm:$0x3] %vm890_vm0, %v361_v31  ;;  %v403_v46 = vrot.slane %v391_v33, %v348_v22  ;;  %v353_v35 = vrot.slane %v341_v34, %v348_v22 }
  0x8e   : > { %v415_v38 = vmul.f32 %v765_v29, %v403_v46  ;;  %v362_v39 = vmul.f32 %v767_v32, %v353_v35 }
  0x8f   : > { %v399_v41 = vpop.permute.xlu1 %398  ;;  %v395_v42 = vpop.permute.xlu0 %394 }
  0x90   : > { %642 = vst.msk [vmem:[%s887_s3 + $0x3] ss:$8 sm:$0x3] %vm890_vm0, %v415_v38  ;;  %637 = vst.msk [vmem:[%s887_s3 + $0x22] ss:$8 sm:$0x3] %vm890_vm0, %v362_v39  ;;  %v411_v2 = vrot.slane %v399_v41, %v348_v22  ;;  %v407_v43 = vrot.slane %v395_v42, %v348_v22 }
  0x92   : > { %v417_v44 = vmul.f32 %v769_v37, %v411_v2  ;;  %v416_v45 = vmul.f32 %v771_v40, %v407_v43 }
  0x94   : > { %644 = vst.msk [vmem:[%s887_s3 + $0x43] ss:$8 sm:$0x3] %vm890_vm0, %v417_v44  ;;  %643 = vst.msk [vmem:[%s887_s3 + $0x23] ss:$8 sm:$0x3] %vm890_vm0, %v416_v45 }
  0x95 PF: > { %s12_s11 = sadd.s32 1, %s794_s11   ;;  %s963_s9 = smov %s790_s10 }
  0x96   : > { %p9_p5 = scmp.ge.s32.totalorder %s12_s11, 4   ;;  %s964_s10 = smov %s966_s12 }
  0x98   :  { %11 = sbr.rel (!%p9_p5) target bundleno = 2 (0x2), region = 80 }

</bundles_post_ra>
